<compile_context>
chip_gen: v7x
topology: tpu7x:2x2x1
jax: 0.10.0
libtpu: 0.0.40
codegen_flags: <defaults>
</compile_context>

<pallas_src>
import functools

import jax
import jax.numpy as jnp
from jax.experimental import pallas as pl
from jax.experimental.pallas import tpu as pltpu

LANE = 128
SUB = 16            # sublane quantum for bf16-packed rows
NEG_INF = -1e30     # bias for padded action lanes -> exp() underflows to 0


def policy_kernel(x_ref,
                  w1_ref, b1_ref,
                  wa1_ref, ba1_ref,
                  wah_ref, bah_ref,
                  probs_ref):
    # x arrives already bf16 (cast + DMA'd at half width by the wrapper).
    x = x_ref[...]

    # affine1 + ReLU : [TB, obs_n] @ [obs_n, 256] -> [TB, 256]  (f32 acc)
    h = jnp.dot(x, w1_ref[...], preferred_element_type=jnp.float32) + b1_ref[...]
    h = jnp.maximum(h, 0.0)

    # action branch : [TB, 256] @ [256, 128] -> [TB, 128]
    xa = jnp.dot(h.astype(jnp.bfloat16), wa1_ref[...],
                 preferred_element_type=jnp.float32) + ba1_ref[...]
    xa = jnp.maximum(xa, 0.0)

    # action head (lane-padded to 128) : [TB, 128] @ [128, 128] -> [TB, 128]
    scores = jnp.dot(xa.astype(jnp.bfloat16), wah_ref[...],
                     preferred_element_type=jnp.float32) + bah_ref[...]

    # numerically stable softmax over the last dim; padded lanes carry a
    # -1e30 bias so exp(score - max) == 0 there and never perturbs probs.
    m = jnp.max(scores, axis=-1, keepdims=True)
    e = jnp.exp(scores - m)
    denom = jnp.sum(e, axis=-1, keepdims=True)
    probs = e * pl.reciprocal(denom, approx=False)
    probs_ref[...] = probs.astype(probs_ref.dtype)


def prepare_params(params):
    """One-time weight preprocessing (hoisted out of the per-step forward).

    Pads the action head to 128 output lanes (weights=0, bias=-1e30 so padded
    logits softmax to exactly 0) and casts matmul operands to bf16.  Cache the
    result; do NOT call this inside the jitted per-step forward.
    """
    (w1, b1, wa1, ba1, wv1, bv1, wah, bah, wvh, bvh) = params
    del wv1, bv1, wvh, bvh  # value branch is discarded by Policy.forward

    action_n = wah.shape[1]
    act_pad = ((action_n + LANE - 1) // LANE) * LANE

    wah_p = jnp.zeros((wah.shape[0], act_pad), wah.dtype).at[:, :action_n].set(wah)
    bah_p = jnp.full((1, act_pad), NEG_INF, jnp.float32).at[:, :action_n].set(
        bah.astype(jnp.float32))

    prepped = (
        w1.astype(jnp.bfloat16),
        b1.astype(jnp.float32),
        wa1.astype(jnp.bfloat16),
        ba1.astype(jnp.float32),
        wah_p.astype(jnp.bfloat16),
        bah_p,
    )
    return prepped, action_n


def policy_forward(x, prepped, *, action_n, block_b=512,
                   out_dtype=jnp.bfloat16):
    """x: [B, obs_n] float32. Returns softmax(action_scores): [B, action_n]."""
    w1_b, b1, wa1_b, ba1, wah_b, bah_p = prepped
    B, obs_n = x.shape
    act_pad = wah_b.shape[1]

    # --- batch tiling: round to the bf16 sublane quantum; split into >= 2
    # grid steps when possible so both v7x TensorCores get work. ---
    b_q = max(SUB, -(-B // SUB) * SUB)
    if b_q >= 2 * SUB:
        half = -(-(b_q // 2) // SUB) * SUB
        tb = min(block_b, half)
    else:
        tb = b_q
    b_pad = -(-b_q // tb) * tb

    # cast x to bf16 (halves the input DMA); pad the batch only if needed.
    if b_pad == B:
        x_p = x.astype(jnp.bfloat16)
    else:
        x_p = jnp.zeros((b_pad, obs_n), jnp.bfloat16).at[:B].set(
            x.astype(jnp.bfloat16))

    grid = (b_pad // tb,)

    def resident(shape):
        # full-array block, constant index_map -> stays VMEM-resident.
        return pl.BlockSpec(shape, lambda i: (0, 0))

    weight_bytes = sum(int(a.size) * a.dtype.itemsize
                       for a in (w1_b, b1, wa1_b, ba1, wah_b, bah_p))
    cost = pl.CostEstimate(
        flops=int(2 * b_pad * (obs_n * 256 + 256 * 128 + 128 * act_pad)),
        transcendentals=int(b_pad * act_pad),
        bytes_accessed=int(x_p.size) * 2 + weight_bytes
                       + int(b_pad * act_pad) * jnp.dtype(out_dtype).itemsize,
    )

    probs_p = pl.pallas_call(
        policy_kernel,
        out_shape=jax.ShapeDtypeStruct((b_pad, act_pad), out_dtype),
        grid=grid,
        in_specs=[
            pl.BlockSpec((tb, obs_n), lambda i: (i, 0)),   # x tiles over batch
            resident(w1_b.shape), resident(b1.shape),
            resident(wa1_b.shape), resident(ba1.shape),
            resident(wah_b.shape), resident(bah_p.shape),
        ],
        out_specs=pl.BlockSpec((tb, act_pad), lambda i: (i, 0)),
        compiler_params=pltpu.CompilerParams(
            dimension_semantics=("parallel",)),
        cost_estimate=cost,
    )(x_p, w1_b, b1, wa1_b, ba1, wah_b, bah_p)

    # Slice back to the module's return shape. (If the caller can accept the
    # lane-padded layout, skip this to avoid one more XLA copy.)
    return probs_p[:B, :action_n]


def init_params(key, obs_n, action_n):
    """Deterministic init mirroring Policy.__init__ / init_weights shapes.

    Weights are stored as [in_features, out_features] (transpose of PyTorch)
    so the kernel does plain `x @ W + b`.
    """
    ks = jax.random.split(key, 10)

    def u(k, shape, lim):
        return jax.random.uniform(k, shape, jnp.float32, -lim, lim)

    w1  = u(ks[0], (obs_n, 256), 0.1)
    b1  = u(ks[1], (1, 256), 1.0 / jnp.sqrt(obs_n))
    wa1 = u(ks[2], (256, 128), 0.1)
    ba1 = u(ks[3], (1, 128), 1.0 / jnp.sqrt(256.0))
    wv1 = u(ks[4], (256, 128), 0.1)          # unused by forward's return
    bv1 = u(ks[5], (1, 128), 1.0 / jnp.sqrt(256.0))
    wah = u(ks[6], (128, action_n), 0.1)
    bah = u(ks[7], (1, action_n), 1.0 / jnp.sqrt(128.0))
    wvh = u(ks[8], (128, 1), 1.0 / jnp.sqrt(128.0))   # unused
    bvh = u(ks[9], (1, 1), 1.0 / jnp.sqrt(128.0))     # unused
    return (w1, b1, wa1, ba1, wv1, bv1, wah, bah, wvh, bvh)


if __name__ == "__main__":
    key = jax.random.PRNGKey(0)
    k_x, k_p = jax.random.split(key)

    B = 2           # batch of observations
    obs_n = 16      # observation_space_n
    action_n = 8    # action_space_n

    x = jax.random.normal(k_x, (B, obs_n), dtype=jnp.float32)
    params = init_params(k_p, obs_n, action_n)

    # hoisted, once-per-policy preprocessing (cache this across steps)
    prepped, act_n = prepare_params(params)

    fwd = jax.jit(functools.partial(policy_forward, action_n=act_n))
    probs = jax.block_until_ready(fwd(x, prepped))

    # sanity: correct shape, finite, non-negative, rows ~ sum to 1 (bf16 out)
    assert probs.shape == (B, action_n)
    p = probs.astype(jnp.float32)
    assert bool(jnp.all(jnp.isfinite(p)))
    assert bool(jnp.all(p >= 0.0))
    assert jnp.allclose(jnp.sum(p, axis=-1), 1.0, atol=2e-2)

    # compare against a pure-JAX f32 reference of the PyTorch forward
    w1, b1, wa1, ba1, _, _, wah, bah, _, _ = params
    h_ref = jnp.maximum(x @ w1 + b1, 0.0)
    xa_ref = jnp.maximum(h_ref @ wa1 + ba1, 0.0)
    ref = jax.nn.softmax(xa_ref @ wah + bah, axis=-1)
    assert jnp.allclose(p, ref, atol=5e-2)  # bf16 matmul/store tolerance

    print("KERNEL_OK")
</pallas_src>

<mosaic_0001>
module attributes {stable_mosaic.version = 11 : i64} {
  func.func @policy_kernel(%arg0: i32, %arg1: memref<16x16xbf16, #tpu.memory_space<vmem>>, %arg2: memref<16x256xbf16, #tpu.memory_space<vmem>>, %arg3: memref<1x256xf32, #tpu.memory_space<vmem>>, %arg4: memref<256x128xbf16, #tpu.memory_space<vmem>>, %arg5: memref<1x128xf32, #tpu.memory_space<vmem>>, %arg6: memref<128x128xbf16, #tpu.memory_space<vmem>>, %arg7: memref<1x128xf32, #tpu.memory_space<vmem>>, %arg8: memref<16x128xbf16, #tpu.memory_space<vmem>>) attributes {dimension_semantics = [#tpu.dimension_semantics<parallel>], iteration_bounds = array<i64: 1>, scalar_prefetch = 0 : i64, scratch_operands = 0 : i64, tpu.core_type = #tpu.core_type<tc>, window_params = [{transform_indices = @transform_0, window_bounds = array<i64: 16, 16>}, {pipeline_mode = #tpu.pipeline_mode<synchronous>, transform_indices = @transform_1, window_bounds = array<i64: 16, 256>}, {pipeline_mode = #tpu.pipeline_mode<synchronous>, transform_indices = @transform_2, window_bounds = array<i64: 1, 256>}, {pipeline_mode = #tpu.pipeline_mode<synchronous>, transform_indices = @transform_3, window_bounds = array<i64: 256, 128>}, {pipeline_mode = #tpu.pipeline_mode<synchronous>, transform_indices = @transform_4, window_bounds = array<i64: 1, 128>}, {pipeline_mode = #tpu.pipeline_mode<synchronous>, transform_indices = @transform_5, window_bounds = array<i64: 128, 128>}, {pipeline_mode = #tpu.pipeline_mode<synchronous>, transform_indices = @transform_6, window_bounds = array<i64: 1, 128>}, {transform_indices = @transform_7, window_bounds = array<i64: 16, 128>}]} {
    %c0 = arith.constant 0 : index
    %c0_0 = arith.constant 0 : index
    %0 = vector.load %arg1[%c0, %c0_0] : memref<16x16xbf16, #tpu.memory_space<vmem>>, vector<16x16xbf16>
    %c0_1 = arith.constant 0 : index
    %c0_2 = arith.constant 0 : index
    %1 = vector.load %arg2[%c0_1, %c0_2] : memref<16x256xbf16, #tpu.memory_space<vmem>>, vector<16x256xbf16>
    %cst = arith.constant dense<0.000000e+00> : vector<16x256xf32>
    %2 = tpu.matmul %0, %1, %cst {dimension_numbers = #tpu.dot_dimension_numbers<[1], [0], [0], [1], [0, 0, 1, 1], [], []>} : vector<16x16xbf16>, vector<16x256xbf16>, vector<16x256xf32> -> vector<16x256xf32>
    %c0_3 = arith.constant 0 : index
    %c0_4 = arith.constant 0 : index
    %3 = vector.load %arg3[%c0_3, %c0_4] : memref<1x256xf32, #tpu.memory_space<vmem>>, vector<1x256xf32>
    %4 = vector.broadcast %3 : vector<1x256xf32> to vector<16x256xf32>
    %5 = arith.addf %2, %4 : vector<16x256xf32>
    %cst_5 = arith.constant 0.000000e+00 : f32
    %6 = vector.broadcast %cst_5 : f32 to vector<16x256xf32>
    %7 = arith.maximumf %5, %6 : vector<16x256xf32>
    %8 = arith.truncf %7 : vector<16x256xf32> to vector<16x256xbf16>
    %c0_6 = arith.constant 0 : index
    %c0_7 = arith.constant 0 : index
    %9 = vector.load %arg4[%c0_6, %c0_7] : memref<256x128xbf16, #tpu.memory_space<vmem>>, vector<256x128xbf16>
    %cst_8 = arith.constant dense<0.000000e+00> : vector<16x128xf32>
    %10 = tpu.matmul %8, %9, %cst_8 {dimension_numbers = #tpu.dot_dimension_numbers<[1], [0], [0], [1], [0, 0, 1, 1], [], []>} : vector<16x256xbf16>, vector<256x128xbf16>, vector<16x128xf32> -> vector<16x128xf32>
    %c0_9 = arith.constant 0 : index
    %c0_10 = arith.constant 0 : index
    %11 = vector.load %arg5[%c0_9, %c0_10] : memref<1x128xf32, #tpu.memory_space<vmem>>, vector<1x128xf32>
    %12 = vector.broadcast %11 : vector<1x128xf32> to vector<16x128xf32>
    %13 = arith.addf %10, %12 : vector<16x128xf32>
    %cst_11 = arith.constant 0.000000e+00 : f32
    %14 = vector.broadcast %cst_11 : f32 to vector<16x128xf32>
    %15 = arith.maximumf %13, %14 : vector<16x128xf32>
    %16 = arith.truncf %15 : vector<16x128xf32> to vector<16x128xbf16>
    %c0_12 = arith.constant 0 : index
    %c0_13 = arith.constant 0 : index
    %17 = vector.load %arg6[%c0_12, %c0_13] : memref<128x128xbf16, #tpu.memory_space<vmem>>, vector<128x128xbf16>
    %cst_14 = arith.constant dense<0.000000e+00> : vector<16x128xf32>
    %18 = tpu.matmul %16, %17, %cst_14 {dimension_numbers = #tpu.dot_dimension_numbers<[1], [0], [0], [1], [0, 0, 1, 1], [], []>} : vector<16x128xbf16>, vector<128x128xbf16>, vector<16x128xf32> -> vector<16x128xf32>
    %c0_15 = arith.constant 0 : index
    %c0_16 = arith.constant 0 : index
    %19 = vector.load %arg7[%c0_15, %c0_16] : memref<1x128xf32, #tpu.memory_space<vmem>>, vector<1x128xf32>
    %20 = vector.broadcast %19 : vector<1x128xf32> to vector<16x128xf32>
    %21 = arith.addf %18, %20 : vector<16x128xf32>
    %cst_17 = arith.constant dense<0xFF800000> : vector<16xf32>
    %22 = vector.multi_reduction <maximumf>, %21, %cst_17 [1] : vector<16x128xf32> to vector<16xf32>
    %23 = vector.shape_cast %22 : vector<16xf32> to vector<16x1xf32>
    %24 = vector.broadcast %23 : vector<16x1xf32> to vector<16x128xf32>
    %25 = arith.subf %21, %24 : vector<16x128xf32>
    %26 = math.exp %25 : vector<16x128xf32>
    %cst_18 = arith.constant dense<0.000000e+00> : vector<16xf32>
    %27 = vector.multi_reduction <add>, %26, %cst_18 [1] : vector<16x128xf32> to vector<16xf32>
    %28 = vector.shape_cast %27 : vector<16xf32> to vector<16x1xf32>
    %29 = tpu.reciprocal %28 : vector<16x1xf32> -> vector<16x1xf32>
    %30 = vector.broadcast %29 : vector<16x1xf32> to vector<16x128xf32>
    %31 = arith.mulf %26, %30 : vector<16x128xf32>
    %32 = arith.truncf %31 : vector<16x128xf32> to vector<16x128xbf16>
    %c0_19 = arith.constant 0 : index
    %c0_20 = arith.constant 0 : index
    %33 = vector.load %arg8[%c0_19, %c0_20] : memref<16x128xbf16, #tpu.memory_space<vmem>>, vector<16x128xbf16>
    tpu.vector_store %arg8[%c0_19, %c0_20], %32 {strides = array<i32>} : memref<16x128xbf16, #tpu.memory_space<vmem>>, vector<16x128xbf16>,
    return
  }
  func.func @transform_0(%arg0: i32) -> (i32, i32) {
    %c0_i32 = arith.constant 0 : i32
    %c0_i32_0 = arith.constant 0 : i32
    return %arg0, %c0_i32 : i32, i32
  }
  func.func @transform_1(%arg0: i32) -> (i32, i32) {
    %c0_i32 = arith.constant 0 : i32
    %c0_i32_0 = arith.constant 0 : i32
    %c0_i32_1 = arith.constant 0 : i32
    return %c0_i32, %c0_i32_0 : i32, i32
  }
  func.func @transform_2(%arg0: i32) -> (i32, i32) {
    %c0_i32 = arith.constant 0 : i32
    %c0_i32_0 = arith.constant 0 : i32
    %c0_i32_1 = arith.constant 0 : i32
    return %c0_i32, %c0_i32_0 : i32, i32
  }
  func.func @transform_3(%arg0: i32) -> (i32, i32) {
    %c0_i32 = arith.constant 0 : i32
    %c0_i32_0 = arith.constant 0 : i32
    %c0_i32_1 = arith.constant 0 : i32
    return %c0_i32, %c0_i32_0 : i32, i32
  }
  func.func @transform_4(%arg0: i32) -> (i32, i32) {
    %c0_i32 = arith.constant 0 : i32
    %c0_i32_0 = arith.constant 0 : i32
    %c0_i32_1 = arith.constant 0 : i32
    return %c0_i32, %c0_i32_0 : i32, i32
  }
  func.func @transform_5(%arg0: i32) -> (i32, i32) {
    %c0_i32 = arith.constant 0 : i32
    %c0_i32_0 = arith.constant 0 : i32
    %c0_i32_1 = arith.constant 0 : i32
    return %c0_i32, %c0_i32_0 : i32, i32
  }
  func.func @transform_6(%arg0: i32) -> (i32, i32) {
    %c0_i32 = arith.constant 0 : i32
    %c0_i32_0 = arith.constant 0 : i32
    %c0_i32_1 = arith.constant 0 : i32
    return %c0_i32, %c0_i32_0 : i32, i32
  }
  func.func @transform_7(%arg0: i32) -> (i32, i32) {
    %c0_i32 = arith.constant 0 : i32
    %c0_i32_0 = arith.constant 0 : i32
    return %arg0, %c0_i32 : i32, i32
  }
}

</mosaic_0001>

<bundles_post_ra>
// kernel: policy_forward.1
= control target key start
LH: loop header
LB: loop body
LE: loop exit
PB: predicated region body
PF: predicated region fallthrough
CT: control target
= control target key end

     0   :  { %12 = vsyncpa [#allocation3], 0  ;;  %s737_s0 = inlined_call_operand.vmem [shape: bf16[16,16], index: 0, kind: input, shape index: {}]   ;;  %s738_s1 = inlined_call_operand.vmem [shape: bf16[16,256], index: 1, kind: input, shape index: {}]   ;;  %s739_s2 = inlined_call_operand.vmem [shape: f32[1,256], index: 2, kind: input, shape index: {}]   ;;  %s740_s3 = inlined_call_operand.hbm [shape: bf16[256,128], index: 3, kind: input, shape index: {}]   ;;  %s741_s4 = inlined_call_operand.vmem [shape: f32[1,128], index: 4, kind: input, shape index: {}]   ;;  %s742_s5 = inlined_call_operand.hbm [shape: bf16[128,128], index: 5, kind: input, shape index: {}]   ;;  %s743_s6 = inlined_call_operand.vmem [shape: f32[1,128], index: 6, kind: input, shape index: {}]   ;;  %s744_s7 = inlined_call_operand.vmem [shape: bf16[16,128], index: 7, kind: output, shape index: {}]  }
   0x1   :  { %13 = vsyncpa [#allocation5], 0  ;;  %s645_s24 = smov [#allocation2]   ;;  %s597_s28 = scalar_lea.hbm %s740_s3, 2048 }
   0x2   :  { %s25_s25 = sshll.u32 %s645_s24, 4  ;;  %p598_p0 = scmp.ne.s32.totalorder %s740_s3, %s597_s28  ;;  %s26_s25 = int_to_ptr.vmem [resolvable:$true] %s25_s25 }
   0x3   :  { %p601_p1 = scmp.lt.u32.totalorder %s597_s28, %s740_s3 }
   0x5   :  { %p603_p2 = pnand %p601_p1, %p598_p0 }
   0x7   :  { %606 = shalt.err (!%p603_p2)
}
   0x8   :  { %s607_s10 = scalar_lea.vmem %s26_s25, 2048  ;;  %p612_p4 = scmp.lt.s32.totalorder %s26_s25, %s26_s25 }
   0x9   :  { %p608_p3 = scmp.ne.s32.totalorder %s26_s25, %s607_s10  ;;  %p613_p5 = scmp.lt.s32.totalorder %s607_s10, %s607_s10 }
   0xb   :  { %p614_p6 = por %p613_p5, %p612_p4 }
   0xd   :  { %p615_p7 = pnand %p614_p6, %p608_p3 }
   0xf   :  { %618 = shalt.err (!%p615_p7)
}
  0x10   :  { %s646_s11 = smov 64   ;;  %s647_s12 = smov 4  }
  0x11   :  { %31 = dma.hbm_to_vmem [thread:$0]  %s740_s3, 2048, %s26_s25, [#allocation3], %s646_s11, %s646_s11, %s647_s12  }
  0x12   :  { %s648_s15 = smov [#allocation4]   ;;  %s619_s19 = scalar_lea.hbm %s742_s5, 1024 }
  0x13   :  { %s39_s16 = sshll.u32 %s648_s15, 4  ;;  %p620_p8 = scmp.ne.s32.totalorder %s742_s5, %s619_s19  ;;  %s40_s16 = int_to_ptr.vmem [resolvable:$true] %s39_s16 }
  0x14   :  { %p623_p9 = scmp.lt.u32.totalorder %s619_s19, %s742_s5 }
  0x16   :  { %p625_p10 = pnand %p623_p9, %p620_p8 }
  0x18   :  { %628 = shalt.err (!%p625_p10)
}
  0x19   :  { %s629_s24 = scalar_lea.vmem %s40_s16, 1024  ;;  %p634_p12 = scmp.lt.s32.totalorder %s40_s16, %s40_s16 }
  0x1a   :  { %p630_p11 = scmp.ne.s32.totalorder %s40_s16, %s629_s24  ;;  %p635_p13 = scmp.lt.s32.totalorder %s629_s24, %s629_s24 }
  0x1c   :  { %p636_p0 = por %p635_p13, %p634_p12 }
  0x1e   :  { %p637_p1 = pnand %p636_p0, %p630_p11 }
  0x20   :  { %640 = shalt.err (!%p637_p1)
}
  0x21   :  { %45 = dma.hbm_to_vmem [thread:$0]  %s742_s5, 1024, %s40_s16, [#allocation5], %s646_s11, %s646_s11, %s647_s12  }
  0x22   :  { %641 = dma.done.wait [#allocation3], 2048  }
  0x23   :  { %642 = vsyncadd [#allocation3], 4294965248 }
  0x24   :  { %643 = dma.done.wait [#allocation5], 1024  }
  0x25   :  { %644 = vsyncadd [#allocation5], 4294966272  ;;  %v649_v0 = vmov 0   ;;  %v561_v1 = vld [vmem:[%s738_s1 + $0x4] ss:$8 sps:$4 sm:$0xff]   ;;  %vm86_vm0 = vcmask 130048   ;;  %v61_v26 = vlaneseq }
  0x26   :  { %122 = vmatprep.mubr.bf16.mxu0 %v649_v0  ;;  %v563_v2 = vld [vmem:[%s738_s1] ss:$8 sps:$4 sm:$0xff]   ;;  %90 = vmatprep.subr.bf16.mxu0 %v561_v1  ;;  %v569_v8 = vld [vmem:[#allocation2 + $0x50] sm:$0xff]   ;;  %v571_v10 = vld [vmem:[#allocation2 + $0x58] sm:$0xff]   ;;  %v650_v21 = vmov 0.0   ;;  %vm651_vm1 = vmmov 0  }
  0x27   :  { %v564_v3 = vld [vmem:[%s737_s0] sm:$0xff]   ;;  %91 = vmatpush1.bf16.msra.mxu0 %v563_v2  ;;  %v567_v6 = vld [vmem:[#allocation2 + $0x48] sm:$0xff]   ;;  %v570_v9 = vld [vmem:[#allocation2 + $0x10] sm:$0xff]   ;;  %v62_v27 = vshrl.u32 %v61_v26, 7 }
  0x28   :  { %v565_v4 = vld [vmem:[#allocation2 + $0x40] sm:$0xff]   ;;  %v568_v7 = vld [vmem:[#allocation2 + $0x8] sm:$0xff]   ;;  %v572_v11 = vld [vmem:[#allocation2 + $0x18] sm:$0xff]   ;;  %534 = vmatprep.subr.bf16.mxu0 %v650_v21 }
  0x29   :  { %v566_v5 = vld [vmem:[#allocation2] sm:$0xff]   ;;  %503 = vmatprep.subr.bf16.mxu1 %v565_v4  ;;  %v575_v14 = vld [vmem:[#allocation2 + $0x68] sm:$0xff]   ;;  %v577_v16 = vld [vmem:[#allocation2 + $0x70] sm:$0xff]   ;;  %v63_v28 = vsub.s32 0, %v62_v27  ;;  %v67_v30 = vsub.s32 1, %v62_v27 }
  0x2a   :  { %467 = vmatmul.mubr.msk.bf16.vlgmr.msra.gmra.mrb[0].mxu0 %vm86_vm0, %v564_v3  ;;  %504 = vmatpush3.bf16.msra.mxu1 %v566_v5  ;;  %v573_v12 = vld [vmem:[#allocation2 + $0x60] sm:$0xff]   ;;  %v576_v15 = vld [vmem:[#allocation2 + $0x28] sm:$0xff]   ;;  %v578_v17 = vld [vmem:[#allocation2 + $0x30] sm:$0xff]  }
  0x2b   :  { %505 = vmatprep.subr.bf16.mxu1 %v567_v6  ;;  %v574_v13 = vld [vmem:[#allocation2 + $0x20] sm:$0xff]   ;;  %v579_v18 = vld [vmem:[#allocation2 + $0x78] sm:$0xff]   ;;  %v582_v22 = vld [vmem:[#allocation4 + $0x8] sm:$0xff]   ;;  %550 = vmatprep.mubr.msk.bf16.mxu0 %vm651_vm1, %v650_v21 }
  0x2c   :  { %v580_v19 = vld [vmem:[#allocation2 + $0x38] sm:$0xff]   ;;  %v581_v20 = vld [vmem:[#allocation4] sm:$0xff]   ;;  %v583_v23 = vld [vmem:[#allocation4 + $0x10] sm:$0xff]  }
  0x2d   :  { %535 = vmatpush3.bf16.msra.mxu0 %v581_v20  ;;  %v584_v24 = vld [vmem:[#allocation4 + $0x18] sm:$0xff]   ;;  %v585_v25 = vld [vmem:[#allocation4 + $0x20] sm:$0xff]   ;;  %v586_v47 = vld [vmem:[#allocation4 + $0x28] sm:$0xff]  }
  0x2e   :  { %506 = vmatpush3.bf16.msra.mxu1 %v568_v7  ;;  %536 = vmatprep.subr.bf16.mxu0 %v650_v21  ;;  %v59_v29 = vld [vmem:[%s739_s2] sm:$0x3]  ;;  %v587_v48 = vld [vmem:[#allocation4 + $0x30] sm:$0xff]   ;;  %v588_v49 = vld [vmem:[#allocation4 + $0x38] sm:$0xff]  }
  0x2f   :  { %507 = vmatprep.subr.bf16.mxu1 %v569_v8  ;;  %v64_v31 = vrot.slane %v59_v29, %v63_v28  ;;  %v68_v32 = vrot.slane %v59_v29, %v67_v30  ;;  %v468_v51 = vld [vmem:[%s741_s4] ss:$0 sm:$0xff] }
  0x30   :  { %v485_v62 = vld [vmem:[%s743_s6] ss:$0 sm:$0xff] }
  0x31   :  { %537 = vmatpush3.bf16.msra.mxu0 %v582_v22 }
  0x32   :  { %508 = vmatpush3.bf16.msra.mxu1 %v570_v9  ;;  %538 = vmatprep.subr.bf16.mxu0 %v650_v21 }
  0x33   :  { %509 = vmatprep.subr.bf16.mxu1 %v571_v10 }
  0x35   :  { %539 = vmatpush3.bf16.msra.mxu0 %v583_v23 }
  0x36   :  { %510 = vmatpush3.bf16.msra.mxu1 %v572_v11  ;;  %540 = vmatprep.subr.bf16.mxu0 %v650_v21 }
  0x37   :  { %511 = vmatprep.subr.bf16.mxu1 %v573_v12 }
  0x39   :  { %541 = vmatpush3.bf16.msra.mxu0 %v584_v24 }
  0x3a   :  { %512 = vmatpush3.bf16.msra.mxu1 %v574_v13  ;;  %542 = vmatprep.subr.bf16.mxu0 %v650_v21 }
  0x3b   :  { %513 = vmatprep.subr.bf16.mxu1 %v575_v14 }
  0x3d   :  { %543 = vmatpush3.bf16.msra.mxu0 %v585_v25 }
  0x3e   :  { %514 = vmatpush3.bf16.msra.mxu1 %v576_v15  ;;  %544 = vmatprep.subr.bf16.mxu0 %v650_v21 }
  0x3f   :  { %515 = vmatprep.subr.bf16.mxu1 %v577_v16 }
  0x41   :  { %545 = vmatpush3.bf16.msra.mxu0 %v586_v47 }
  0x42   :  { %516 = vmatpush3.bf16.msra.mxu1 %v578_v17  ;;  %546 = vmatprep.subr.bf16.mxu0 %v650_v21 }
  0x43   :  { %517 = vmatprep.subr.bf16.mxu1 %v579_v18 }
  0x45   :  { %547 = vmatpush3.bf16.msra.mxu0 %v587_v48 }
  0x46   :  { %518 = vmatpush3.bf16.msra.mxu1 %v580_v19  ;;  %548 = vmatprep.subr.bf16.mxu0 %v650_v21 }
  0x49   :  { %549 = vmatpush3.bf16.msra.mxu0 %v588_v49 }
  0xfd   :  { %v124_v33 = vpop.f32.mrb[0].mxu0 }
  0xfe   :  { %v125_v34 = vadd.f32 %v124_v33, %v64_v31  ;;  %v126_v35 = vpop.f32.mrb[1].mxu0 }
  0xff   :  { %v127_v36 = vadd.f32 %v126_v35, %v68_v32  ;;  %v128_v37 = vpop.f32.mrb[2].mxu0 }
 0x100   :  { %v129_v38 = vadd.f32 %v128_v37, %v64_v31  ;;  %v130_v39 = vpop.f32.mrb[3].mxu0  ;;  %v133_v41 = vmax.f32 %v125_v34, 0.0 }
 0x101   :  { %v131_v40 = vadd.f32 %v130_v39, %v68_v32  ;;  %v134_v43 = vmax.f32 %v127_v36, 0.0 }
 0x102   :  { %v135_v42 = vmax.f32 %v129_v38, 0.0 }
 0x103   :  { %v136_v44 = vmax.f32 %v131_v40, 0.0 }
 0x104   :  { %v137_v45 = vpack.c.bf16 %v135_v42, %v133_v41 }
 0x105   :  { %v138_v46 = vpack.c.bf16 %v136_v44, %v134_v43 }
 0x107   :  { %306 = vmatprep.mubr.bf16.mxu1 %v138_v46 }
 0x108   :  { %307 = vmatmul.mubr.bf16.vlgmr.msra.gmra.mrb[0].mxu1 %v137_v45 }
 0x1db   :  { %v519_v50 = vpop.f32.mrb[0].mxu1 }
 0x1dc   :  { %v520_v52 = vpop.f32.mrb[1].mxu1 }
 0x1dd   :  { %v521_v53 = vadd.f32 %v520_v52, %v519_v50  ;;  %v522_v54 = vpop.f32.mrb[2].mxu1 }
 0x1de   :  { %v523_v55 = vpop.f32.mrb[3].mxu1 }
 0x1df   :  { %v309_v56 = vadd.f32 %v521_v53, %v468_v51  ;;  %v524_v57 = vadd.f32 %v523_v55, %v522_v54 }
 0x1e1   :  { %v312_v58 = vadd.f32 %v524_v57, %v468_v51  ;;  %v315_v59 = vmax.f32 %v309_v56, 0.0 }
 0x1e3   :  { %v316_v60 = vmax.f32 %v312_v58, 0.0 }
 0x1e5   :  { %v317_v61 = vpack.c.bf16 %v316_v60, %v315_v59 }
 0x1e7   :  { %551 = vmatmul.mubr.bf16.vlgmr.msra.gmra.mrb[4].mxu0 %v317_v61 }
 0x2ba   :  { %v423_v63 = vpop.f32.mrb[4].mxu0 }
 0x2bb   :  { %v424_v0 = vadd.f32 %v485_v62, %v423_v63  ;;  %v552_v1 = vpop.f32.mrb[5].mxu0 }
 0x2bc   :  { %v426_v2 = vpop.f32.mrb[6].mxu0 }
 0x2bd   :  { %430 = vmax.xlane.f32.xlu0 %v424_v0  ;;  %v553_v3 = vpop.f32.mrb[7].mxu0  ;;  %v427_v4 = vadd.f32 %v485_v62, %v426_v2 }
 0x2c1   :  { %432 = vmax.xlane.f32.xlu0 %v427_v4 }
 0x34a   :  { %v431_v5 = vpop.xlane.xlu0 %430 }
 0x34b   :  { %v434_v6 = vsub.f32 %v424_v0, %v431_v5 }
 0x34d   :  { %v436_v7 = vmul.f32 1.442695, %v434_v6 }
 0x34e   :  { %v433_v8 = vpop.xlane.xlu0 %432 }
 0x34f   :  { %589 = vpow2.f32 %v436_v7  ;;  %v435_v9 = vsub.f32 %v427_v4, %v433_v8 }
 0x351   :  { %v438_v10 = vmul.f32 1.442695, %v435_v9 }
 0x353   :  { %591 = vpow2.f32 %v438_v10 }
 0x359   :  { %v590_v11 = vpop.eup %589 }
 0x35a   :  { %440 = vadd.xlane.f32.xlu1 %v590_v11 }
 0x35d   :  { %v592_v12 = vpop.eup %591 }
 0x35e   :  { %442 = vadd.xlane.f32.xlu1 %v592_v12 }
 0x3e7   :  { %v441_v13 = vpop.xlane.xlu1 %440 }
 0x3e8   :  { %593 = vrcp.f32 %v441_v13 }
 0x3eb   :  { %v443_v14 = vpop.xlane.xlu1 %442 }
 0x3ec   :  { %595 = vrcp.f32 %v443_v14 }
 0x3f2   :  { %v594_v15 = vpop.eup %593 }
 0x3f3   :  { %v446_v17 = vmul.f32 %v594_v15, %v590_v11 }
 0x3f6   :  { %v596_v16 = vpop.eup %595 }
 0x3f7   :  { %v447_v18 = vmul.f32 %v596_v16, %v592_v12 }
 0x3f9   :  { %v501_v19 = vpack.c.bf16 %v447_v18, %v446_v17 }
 0x3fb   :  { %502 = vst [vmem:[%s744_s7] sm:$0xff] %v501_v19  }
 0x3fc   :  { %462 = vsyncpa [#allocation3], 1 }
 0x3fd   :  { %463 = vsyncpa [#allocation5], 1 }

</bundles_post_ra>
